<compile_context>
chip_gen: v7x
topology: tpu7x:2x2x1
jax: 0.10.0
libtpu: 0.0.40
codegen_flags: <defaults>
</compile_context>

<pallas_src>
import functools

import numpy as np

import jax
import jax.numpy as jnp
from jax.experimental import pallas as pl
from jax.experimental.pallas import tpu as pltpu


def make_positional_encoding_table(max_len: int, num_hiddens: int) -> jnp.ndarray:
    """Build P exactly as the PyTorch __init__ does (shape (max_len, num_hiddens))."""
    pos = jnp.arange(max_len, dtype=jnp.float32).reshape(-1, 1)
    div = jnp.power(
        10000.0, jnp.arange(0, num_hiddens, 2, dtype=jnp.float32) / num_hiddens
    )
    angles = pos / div                                  # (max_len, num_hiddens // 2)
    P = jnp.zeros((max_len, num_hiddens), dtype=jnp.float32)
    P = P.at[:, 0::2].set(jnp.sin(angles))
    P = P.at[:, 1::2].set(jnp.cos(angles))
    return P


# ----------------------------------------------------------------------------- kernels


def _pe_add_kernel(x_ref, p_ref, o_ref):
    # x block (tb, tl, Df), p block (1, tl, Df) -> broadcast add on the VPU.
    o_ref[...] = (x_ref[...] + p_ref[...]).astype(o_ref.dtype)


def _make_pe_dropout_prng_kernel(threshold: int, scale: float):
    """Training path on real TPU: in-kernel hardware PRNG, no mask HBM traffic."""

    def kernel(seed_ref, x_ref, p_ref, o_ref):
        # Unique stream per grid block.
        pltpu.prng_seed(seed_ref[0], pl.program_id(0), pl.program_id(1))
        bits = pltpu.prng_random_bits(x_ref.shape)
        if bits.dtype != jnp.uint32:
            bits = pltpu.bitcast(bits, jnp.uint32)
        y = x_ref[...] + p_ref[...]
        # Inverted dropout: P(keep) = P(bits >= thr) = 1 - rate (thr is a numpy
        # scalar -> jaxpr literal, NOT a captured constant).
        keep = bits >= np.uint32(threshold)
        o_ref[...] = jnp.where(keep, y * scale, 0.0).astype(o_ref.dtype)

    return kernel


def _make_pe_dropout_bits_kernel(threshold: int, scale: float):
    """Portable fallback (interpret / non-TPU): uint8 mask streamed from HBM."""

    def kernel(x_ref, p_ref, bits_ref, o_ref):
        y = x_ref[...] + p_ref[...]
        keep = bits_ref[...] >= np.uint8(threshold)
        o_ref[...] = jnp.where(keep, y * scale, 0.0).astype(o_ref.dtype)

    return kernel


# ----------------------------------------------------------------------------- layout helpers

_TARGET_BLOCK_BYTES = 2 << 20        # ~2 MiB per operand block (safe on v7x 32 MiB scoped VMEM)
_VMEM_LIMIT_BYTES = 32 * 1024 * 1024


def _lane_fold_factor(D: int) -> int:
    """Fold g rows into the lane axis when D is narrower than a 128-lane vreg."""
    if D < 128 and 128 % D == 0:
        return 128 // D
    return 1


def _row_tile(Lf: int, Df: int, itemsize: int, target_bytes: int) -> int:
    """Pick a sequence-row tile of ~target_bytes (multiple of 8 rows or full Lf)."""
    rows = max(1, target_bytes // max(1, Df * itemsize))
    if rows >= Lf:
        return Lf
    rows = max(8, (rows // 8) * 8)
    return min(rows, Lf)


def _batch_tile(B: int, Lf: int, Df: int, itemsize: int, tl: int, target_bytes: int) -> int:
    """Merge whole batches into the block when one folded sequence fits in a tile."""
    if tl != Lf:
        return 1
    per_batch = Lf * Df * itemsize
    tb = int(max(1, min(B, target_bytes // max(1, per_batch))))
    while B % tb != 0:               # keep an exact grid on the batch axis
        tb -= 1
    return tb


# ----------------------------------------------------------------------------- wrapper


@functools.partial(jax.jit, static_argnames=("dropout_rate", "training"))
def positional_encoding_fwd(x, P, key=None, *, dropout_rate=0.0, training=False):
    """X + P[:, :L, :] followed by (inverted) dropout; identity dropout in eval."""
    B, L, D = x.shape
    rate = float(dropout_rate)
    apply_dropout = bool(training) and rate > 0.0
    if apply_dropout and not (0.0 < rate < 1.0):
        raise ValueError("dropout_rate must be in [0, 1)")
    if apply_dropout and key is None:
        raise ValueError("training dropout requires a PRNG key")

    # --- glue / layout plumbing in plain JAX (done once, not per grid step) ---
    p_slice = P[:L, :].astype(x.dtype)                   # (L, D)

    g = _lane_fold_factor(D)                             # lane-dense fold for narrow D
    pad = (-L) % g                                       # pad seq so the fold divides
    if pad:
        x = jnp.pad(x, ((0, 0), (0, pad), (0, 0)))
        p_slice = jnp.pad(p_slice, ((0, pad), (0, 0)))
    Lp = L + pad
    Lf, Df = Lp // g, D * g
    xf = x.reshape(B, Lf, Df)
    pf = p_slice.reshape(1, Lf, Df)

    itemsize = x.dtype.itemsize
    tl = _row_tile(Lf, Df, itemsize, _TARGET_BLOCK_BYTES)
    tb = _batch_tile(B, Lf, Df, itemsize, tl, _TARGET_BLOCK_BYTES)
    n_l = pl.cdiv(Lf, tl)
    n_b = B // tb
    # Seq axis OUTER, batch axis INNER: P's block index (0, lt, 0) is constant
    # across consecutive inner steps, so Pallas skips re-DMA of P.
    grid = (n_l, n_b)

    compiler_params = pltpu.CompilerParams(
        dimension_semantics=("parallel", "parallel"),
        vmem_limit_bytes=_VMEM_LIMIT_BYTES,
    )
    out_shape = jax.ShapeDtypeStruct((B, Lf, Df), x.dtype)
    n_elems = B * Lp * D
    base_bytes = (2 * n_elems + Lp * D) * itemsize       # x read + out write + P once

    if not apply_dropout:
        out = pl.pallas_call(
            _pe_add_kernel,
            out_shape=out_shape,
            grid=grid,
            in_specs=[
                pl.BlockSpec((tb, tl, Df), lambda lt, bt: (bt, lt, 0)),
                pl.BlockSpec((1, tl, Df), lambda lt, bt: (0, lt, 0)),
            ],
            out_specs=pl.BlockSpec((tb, tl, Df), lambda lt, bt: (bt, lt, 0)),
            compiler_params=compiler_params,
            cost_estimate=pl.CostEstimate(
                flops=n_elems, transcendentals=0, bytes_accessed=base_bytes),
        )(xf, pf)
    else:
        scale = 1.0 / (1.0 - rate)
        if jax.default_backend() == "tpu":
            # Fast path: in-kernel hardware PRNG, no mask traffic from HBM.
            threshold = min(int(round(rate * 4294967296.0)), 4294967295)
            seed = jax.random.randint(
                key, (1,), 0, jnp.iinfo(jnp.int32).max, dtype=jnp.int32)
            kernel = _make_pe_dropout_prng_kernel(threshold, scale)
            grid_spec = pltpu.PrefetchScalarGridSpec(
                num_scalar_prefetch=1,
                grid=grid,
                in_specs=[
                    pl.BlockSpec((tb, tl, Df), lambda lt, bt, seed_ref: (bt, lt, 0)),
                    pl.BlockSpec((1, tl, Df), lambda lt, bt, seed_ref: (0, lt, 0)),
                ],
                out_specs=pl.BlockSpec(
                    (tb, tl, Df), lambda lt, bt, seed_ref: (bt, lt, 0)),
            )
            out = pl.pallas_call(
                kernel,
                out_shape=out_shape,
                grid_spec=grid_spec,
                compiler_params=compiler_params,
                cost_estimate=pl.CostEstimate(
                    flops=3 * n_elems, transcendentals=0, bytes_accessed=base_bytes),
            )(seed, xf, pf)
        else:
            # Portable fallback: uint8 mask (1 B/elem, 4x less than uint32).
            threshold = min(int(round(rate * 256.0)), 255)
            bits = jax.random.bits(key, (B, Lf, Df), dtype=jnp.uint8)
            kernel = _make_pe_dropout_bits_kernel(threshold, scale)
            out = pl.pallas_call(
                kernel,
                out_shape=out_shape,
                grid=grid,
                in_specs=[
                    pl.BlockSpec((tb, tl, Df), lambda lt, bt: (bt, lt, 0)),
                    pl.BlockSpec((1, tl, Df), lambda lt, bt: (0, lt, 0)),
                    pl.BlockSpec((tb, tl, Df), lambda lt, bt: (bt, lt, 0)),
                ],
                out_specs=pl.BlockSpec((tb, tl, Df), lambda lt, bt: (bt, lt, 0)),
                compiler_params=compiler_params,
                cost_estimate=pl.CostEstimate(
                    flops=3 * n_elems, transcendentals=0,
                    bytes_accessed=base_bytes + n_elems),
            )(xf, pf, bits)

    out = out.reshape(B, Lp, D)
    if pad:
        out = out[:, :L, :]
    return out


# ----------------------------------------------------------------------------- test


if __name__ == "__main__":
    # Module config (synthetic, deterministic — no checkpoint load).
    num_hiddens = 32
    max_len = 1000
    dropout_rate = 0.1
    batch, seq_len = 2, 8

    root = jax.random.PRNGKey(0)
    kx, kdrop = jax.random.split(root)
    x = jax.random.normal(kx, (batch, seq_len, num_hiddens), dtype=jnp.float32)
    P = make_positional_encoding_table(max_len, num_hiddens)
    ref = x + P[None, :seq_len, :]

    # Eval mode (dropout is identity) — check against pure-JAX reference.
    out_eval = positional_encoding_fwd(
        x, P, dropout_rate=dropout_rate, training=False
    )
    jax.block_until_ready(out_eval)
    assert out_eval.shape == x.shape
    assert jnp.allclose(out_eval, ref, atol=1e-5, rtol=1e-5), "eval mismatch"

    # Training mode — inverted dropout: each element is 0 or (x+P)/(1-rate).
    out_train = positional_encoding_fwd(
        x, P, kdrop, dropout_rate=dropout_rate, training=True
    )
    jax.block_until_ready(out_train)
    assert out_train.shape == x.shape
    # Note: elements where x+P happens to be exactly 0 are misclassified as
    # dropped; benign for random float data.
    kept = out_train != 0
    scale = 1.0 / (1.0 - dropout_rate)
    assert jnp.allclose(
        jnp.where(kept, out_train, 0.0),
        jnp.where(kept, ref * scale, 0.0),
        atol=1e-4,
        rtol=1e-4,
    ), "train mismatch"

    print("KERNEL_OK")
</pallas_src>

<mosaic_0001>
module attributes {stable_mosaic.version = 11 : i64} {
  func.func @_pe_add_kernel(%arg0: i32, %arg1: i32, %arg2: memref<2x2x128xf32, #tpu.memory_space<vmem>>, %arg3: memref<1x2x128xf32, #tpu.memory_space<vmem>>, %arg4: memref<2x2x128xf32, #tpu.memory_space<vmem>>) attributes {dimension_semantics = [#tpu.dimension_semantics<parallel>, #tpu.dimension_semantics<parallel>], iteration_bounds = array<i64: 1, 1>, scalar_prefetch = 0 : i64, scratch_operands = 0 : i64, tpu.core_type = #tpu.core_type<tc>, window_params = [{transform_indices = @transform_0, window_bounds = array<i64: 2, 2, 128>}, {transform_indices = @transform_1, window_bounds = array<i64: 1, 2, 128>}, {transform_indices = @transform_2, window_bounds = array<i64: 2, 2, 128>}]} {
    %c0 = arith.constant 0 : index
    %c0_0 = arith.constant 0 : index
    %c0_1 = arith.constant 0 : index
    %0 = vector.load %arg2[%c0, %c0_0, %c0_1] : memref<2x2x128xf32, #tpu.memory_space<vmem>>, vector<2x2x128xf32>
    %c0_2 = arith.constant 0 : index
    %c0_3 = arith.constant 0 : index
    %c0_4 = arith.constant 0 : index
    %1 = vector.load %arg3[%c0_2, %c0_3, %c0_4] : memref<1x2x128xf32, #tpu.memory_space<vmem>>, vector<1x2x128xf32>
    %2 = vector.broadcast %1 : vector<1x2x128xf32> to vector<2x2x128xf32>
    %3 = arith.addf %0, %2 : vector<2x2x128xf32>
    %c0_5 = arith.constant 0 : index
    %c0_6 = arith.constant 0 : index
    %c0_7 = arith.constant 0 : index
    %4 = vector.load %arg4[%c0_5, %c0_6, %c0_7] : memref<2x2x128xf32, #tpu.memory_space<vmem>>, vector<2x2x128xf32>
    tpu.vector_store %arg4[%c0_5, %c0_6, %c0_7], %3 {strides = array<i32>} : memref<2x2x128xf32, #tpu.memory_space<vmem>>, vector<2x2x128xf32>,
    return
  }
  func.func @transform_0(%arg0: i32, %arg1: i32) -> (i32, i32, i32) {
    %c0_i32 = arith.constant 0 : i32
    %c0_i32_0 = arith.constant 0 : i32
    return %arg1, %arg0, %c0_i32 : i32, i32, i32
  }
  func.func @transform_1(%arg0: i32, %arg1: i32) -> (i32, i32, i32) {
    %c0_i32 = arith.constant 0 : i32
    %c0_i32_0 = arith.constant 0 : i32
    %c0_i32_1 = arith.constant 0 : i32
    return %c0_i32, %arg0, %c0_i32_0 : i32, i32, i32
  }
  func.func @transform_2(%arg0: i32, %arg1: i32) -> (i32, i32, i32) {
    %c0_i32 = arith.constant 0 : i32
    %c0_i32_0 = arith.constant 0 : i32
    return %arg1, %arg0, %c0_i32 : i32, i32, i32
  }
}

</mosaic_0001>

<bundles_post_ra>
// kernel: positional_encoding_fwd.1
= control target key start
LH: loop header
LB: loop body
LE: loop exit
PB: predicated region body
PF: predicated region fallthrough
CT: control target
= control target key end

     0   :  { %s52_s0 = inlined_call_operand.vmem [shape: f32[2,2,128], index: 0, kind: input, shape index: {}]   ;;  %s53_s1 = inlined_call_operand.vmem [shape: f32[1,2,128], index: 1, kind: input, shape index: {}]   ;;  %s54_s2 = inlined_call_operand.vmem [shape: f32[2,2,128], index: 2, kind: output, shape index: {}]  }
   0x1   :  { %v11_v0 = vld [vmem:[%s52_s0] sm:$0x3]  ;;  %v12_v2 = vld [vmem:[%s52_s0 + $0x2] sm:$0x3] }
   0x2   :  { %v13_v1 = vld [vmem:[%s53_s1] sm:$0x3] }
   0x3   :  { %v14_v3 = vadd.f32 %v13_v1, %v11_v0  ;;  %v15_v4 = vadd.f32 %v13_v1, %v12_v2 }
   0x5   :  { %16 = vst [vmem:[%s54_s2] sm:$0x3] %v14_v3  ;;  %17 = vst [vmem:[%s54_s2 + $0x2] sm:$0x3] %v15_v4 }

</bundles_post_ra>
